<compile_context>
chip_gen: v6e
topology: v6e:2x2x1
jax: 0.10.0
libtpu: 0.0.40
codegen_flags: <defaults>
</compile_context>

<pallas_src>
import numpy as np
import jax
import jax.numpy as jnp
from jax.experimental import pallas as pl
from jax.experimental.pallas import tpu as pltpu

# ---------------- geometry / model sizes ----------------
N, C, H, W = 2, 3, 16, 16
MARGIN = 2                                   # analog of margin=10 on a 224x224 image
HC, WC = H - 2 * MARGIN, W - 2 * MARGIN      # cropped spatial (12, 12)
HO, WO = H, W                                # resized back to full resolution (16, 16)
F1, FEAT = 32, 64                            # synthetic backbone widths (analog of 2048)
NB = 2 * N                                   # gen + tar images processed as one batch

MEAN_BGR = np.array([91.4953, 103.8827, 131.0912], dtype=np.float64)


def _bilinear_matrix(out_size, in_size):
    """F.interpolate(mode='bilinear', align_corners=False) as an (out, in) matrix."""
    A = np.zeros((out_size, in_size), dtype=np.float64)
    scale = in_size / out_size
    for j in range(out_size):
        src = max((j + 0.5) * scale - 0.5, 0.0)
        i0 = min(int(np.floor(src)), in_size - 1)
        i1 = min(i0 + 1, in_size - 1)
        w1 = src - i0
        A[j, i0] += 1.0 - w1
        A[j, i1] += w1
    return A


def build_constants(w1_bgr, w2):
    """Host-side (numpy, one-time) precompute of the fused-pipeline constants."""
    a_h = _bilinear_matrix(HO, HC)                          # (HO, HC)
    a_w = _bilinear_matrix(WO, WC)                          # (WO, WC)
    # Embed the margin crop as zero columns so the operator acts on full planes.
    a_h_pad = np.zeros((HO, H)); a_h_pad[:, MARGIN:H - MARGIN] = a_h
    a_w_pad = np.zeros((WO, W)); a_w_pad[:, MARGIN:W - MARGIN] = a_w
    # crop + bilinear resize of a row-major flattened plane:  z_flat = x_flat @ M
    M = np.kron(a_h_pad, a_w_pad).T                         # (H*W, HO*WO)
    # transform(): (x*255 - mean_bgr)*2 - 1 == 510*x - (2*mean + 1). The scale folds
    # into R (resize is linear); the constant folds into a per-row bias (bilinear
    # resize of a constant plane is that constant).
    R = (510.0 * M).astype(np.float32)                      # (H*W, HO*WO)
    # Rows are ordered (image, stored RGB channel); stored channel c uses
    # mean_bgr[2-c], which is exactly the img[:, [2,1,0]] BGR flip of the spec.
    bias_c = -(2.0 * MEAN_BGR[::-1] + 1.0)                  # per stored-channel bias
    bias_rows = np.tile(bias_c, NB).reshape(NB * C, 1).astype(np.float32)
    # The (synthetic) backbone's first layer consumes BGR-ordered channels, like the
    # real ResNet; fold the flip by reversing w1's channel columns, then
    # block-diagonalise so all 2N images (gen + tar) use a single MXU matmul.
    w1_rgb = np.asarray(w1_bgr)[:, ::-1]                    # (F1, C) on stored order
    w1k = np.kron(np.eye(NB), w1_rgb).astype(np.float32)    # (NB*F1, NB*C) = (128, 12)
    # Fold the GAP 1/(HO*WO) scale into the final linear layer.
    w2_fold = (np.asarray(w2, dtype=np.float64) / (HO * WO)).astype(np.float32)
    return (jnp.asarray(R), jnp.asarray(bias_rows), jnp.asarray(w1k),
            jnp.asarray(w2_fold))


# ------------- fused kernel: preprocess + resize + head + cosine loss -------------
def vggface2_kernel(x_ref, r_ref, bias_ref, w1k_ref, w2_ref, loss_ref):
    eps = jnp.float32(1e-8)
    # x: (NB*C, H*W) raw planes in [0,1]; rows = (image, stored-RGB channel), with
    # images ordered [gen_0..gen_{N-1}, tar_0..tar_{N-1}]; pixels sit on the
    # 256-wide lane axis (lane-dense loads, matmul outputs and stores).
    x = x_ref[...]
    # BGR flip + (*255 - mean) + crop + (*2 - 1) + bilinear resize, all as a single
    # MXU matmul (K=256, N=256) plus a per-channel bias add.
    z = jnp.dot(x, r_ref[...], preferred_element_type=jnp.float32) + bias_ref[...]   # (NB*C, HO*WO)
    # TODO(synk): the pretrained ResNet50 (resnet50_ft_weight.pkl) cannot be loaded
    # here; synthetic head = 1x1 conv + ReLU + global-avg-pool + linear.
    h = jnp.maximum(jnp.dot(w1k_ref[...], z, preferred_element_type=jnp.float32), 0.0)  # (NB*F1, HO*WO)
    pooled = jnp.sum(h, axis=1, keepdims=True)              # (NB*F1, 1); 1/P folded into w2
    rows = []
    for i in range(NB):                                     # static unroll, tiny epilogue
        p_i = pooled[i * F1:(i + 1) * F1, :]                # (F1, 1)
        rows.append(jnp.sum(w2_ref[...] * p_i, axis=0, keepdims=True))   # (1, FEAT)
    feats = jnp.concatenate(rows, axis=0)                   # (NB, FEAT)
    g, t = feats[:N, :], feats[N:, :]
    # F.cosine_similarity(dim=1, eps=1e-8): each norm is clamped separately.
    dot = jnp.sum(g * t, axis=1, keepdims=True)             # (N, 1)
    ng = jnp.maximum(jnp.sqrt(jnp.sum(g * g, axis=1, keepdims=True)), eps)
    nt = jnp.maximum(jnp.sqrt(jnp.sum(t * t, axis=1, keepdims=True)), eps)
    loss_ref[0, 0] = jnp.mean(1.0 - dot / (ng * nt))        # (1 - cos).mean()


@jax.jit
def vggface2_loss(gen, tar, R, bias_rows, w1k, w2_fold):
    n, c, h, w = gen.shape
    # Free reshapes + one tiny (2*n*c, h*w) concat; XLA fuses this into the input DMA.
    x = jnp.concatenate([gen.reshape(n * c, h * w), tar.reshape(n * c, h * w)], axis=0)
    out = pl.pallas_call(
        vggface2_kernel,
        out_shape=jax.ShapeDtypeStruct((1, 1), jnp.float32),
        in_specs=[pl.BlockSpec(memory_space=pltpu.MemorySpace.VMEM)] * 5,
        out_specs=pl.BlockSpec(memory_space=pltpu.MemorySpace.SMEM),
    )(x, R, bias_rows, w1k, w2_fold)
    return out[0, 0]


# ---------------- pure-JAX reference (mirrors the PyTorch op order) ----------------
def reference_loss(gen, tar, w1_bgr, w2):
    a_h = jnp.asarray(_bilinear_matrix(HO, HC), dtype=jnp.float32)
    a_w = jnp.asarray(_bilinear_matrix(WO, WC), dtype=jnp.float32)
    mean = jnp.asarray(MEAN_BGR, dtype=jnp.float32)
    w1j = jnp.asarray(np.asarray(w1_bgr, dtype=np.float32))
    w2j = jnp.asarray(np.asarray(w2, dtype=np.float32))

    def feats(img):
        x = img[:, ::-1, :, :]                                   # RGB -> BGR
        x = x * 255.0 - mean[None, :, None, None]                # transform()
        x = x[:, :, MARGIN:H - MARGIN, MARGIN:W - MARGIN]        # crop
        x = x * 2.0 - 1.0
        x = jnp.einsum('oh,nchw,pw->ncop', a_h, x, a_w)          # bilinear resize
        xf = x.reshape(N, C, HO * WO)
        hh = jnp.maximum(jnp.einsum('fc,ncp->nfp', w1j, xf), 0.0)
        pooled = hh.mean(axis=2)                                 # (N, F1)
        return pooled @ w2j                                      # (N, FEAT)

    g = feats(gen); t = feats(tar)
    eps = 1e-8
    gu = g / jnp.maximum(jnp.linalg.norm(g, axis=1, keepdims=True), eps)
    tu = t / jnp.maximum(jnp.linalg.norm(t, axis=1, keepdims=True), eps)
    return jnp.mean(1.0 - jnp.sum(gu * tu, axis=1))


if __name__ == "__main__":
    key = jax.random.PRNGKey(0)
    k1, k2, k3, k4 = jax.random.split(key, 4)
    gen = jax.random.uniform(k1, (N, C, H, W), dtype=jnp.float32)   # images in [0, 1]
    tar = jax.random.uniform(k2, (N, C, H, W), dtype=jnp.float32)

    # deterministic synthetic backbone weights (w1 columns indexed in BGR order,
    # matching how the real backbone would consume channels)
    w1_bgr = np.asarray(jax.random.normal(k3, (F1, C), dtype=jnp.float32)) * 0.1
    w2 = np.asarray(jax.random.normal(k4, (F1, FEAT), dtype=jnp.float32)) * 0.1

    R, bias_rows, w1k, w2_fold = build_constants(w1_bgr, w2)

    loss = vggface2_loss(gen, tar, R, bias_rows, w1k, w2_fold)
    jax.block_until_ready(loss)

    ref = reference_loss(gen, tar, w1_bgr, w2)
    if not np.allclose(np.asarray(loss), np.asarray(ref), rtol=1e-2, atol=1e-3):
        raise AssertionError(f"kernel={float(loss)} ref={float(ref)}")
    print("KERNEL_OK")
</pallas_src>

<mosaic_0001>
module attributes {stable_mosaic.version = 11 : i64} {
  func.func @vggface2_kernel(%arg0: memref<12x256xf32, #tpu.memory_space<vmem>>, %arg1: memref<256x256xf32, #tpu.memory_space<vmem>>, %arg2: memref<12x1xf32, #tpu.memory_space<vmem>>, %arg3: memref<128x12xf32, #tpu.memory_space<vmem>>, %arg4: memref<32x64xf32, #tpu.memory_space<vmem>>, %arg5: memref<1x1xf32, #tpu.memory_space<smem>>) attributes {dimension_semantics = [], scalar_prefetch = 0 : i64, scratch_operands = 0 : i64, tpu.core_type = #tpu.core_type<tc>} {
    %c0 = arith.constant 0 : index
    %c0_0 = arith.constant 0 : index
    %0 = vector.load %arg0[%c0, %c0_0] : memref<12x256xf32, #tpu.memory_space<vmem>>, vector<12x256xf32>
    %c0_1 = arith.constant 0 : index
    %c0_2 = arith.constant 0 : index
    %1 = vector.load %arg1[%c0_1, %c0_2] : memref<256x256xf32, #tpu.memory_space<vmem>>, vector<256x256xf32>
    %cst = arith.constant dense<0.000000e+00> : vector<12x256xf32>
    %2 = tpu.matmul %0, %1, %cst {dimension_numbers = #tpu.dot_dimension_numbers<[1], [0], [0], [1], [0, 0, 1, 1], [], []>} : vector<12x256xf32>, vector<256x256xf32>, vector<12x256xf32> -> vector<12x256xf32>
    %c0_3 = arith.constant 0 : index
    %c0_4 = arith.constant 0 : index
    %3 = vector.load %arg2[%c0_3, %c0_4] : memref<12x1xf32, #tpu.memory_space<vmem>>, vector<12x1xf32>
    %4 = vector.broadcast %3 : vector<12x1xf32> to vector<12x256xf32>
    %5 = arith.addf %2, %4 : vector<12x256xf32>
    %c0_5 = arith.constant 0 : index
    %c0_6 = arith.constant 0 : index
    %6 = vector.load %arg3[%c0_5, %c0_6] : memref<128x12xf32, #tpu.memory_space<vmem>>, vector<128x12xf32>
    %cst_7 = arith.constant dense<0.000000e+00> : vector<128x256xf32>
    %7 = tpu.matmul %6, %5, %cst_7 {dimension_numbers = #tpu.dot_dimension_numbers<[1], [0], [0], [1], [0, 0, 1, 1], [], []>} : vector<128x12xf32>, vector<12x256xf32>, vector<128x256xf32> -> vector<128x256xf32>
    %cst_8 = arith.constant 0.000000e+00 : f32
    %8 = vector.broadcast %cst_8 : f32 to vector<128x256xf32>
    %9 = arith.maximumf %7, %8 : vector<128x256xf32>
    %cst_9 = arith.constant dense<0.000000e+00> : vector<128xf32>
    %10 = vector.multi_reduction <add>, %9, %cst_9 [1] : vector<128x256xf32> to vector<128xf32>
    %11 = vector.shape_cast %10 : vector<128xf32> to vector<128x1xf32>
    %12 = vector.extract_strided_slice %11 {offsets = [0, 0], sizes = [32, 1], strides = [1, 1]} : vector<128x1xf32> to vector<32x1xf32>
    %c0_10 = arith.constant 0 : index
    %c0_11 = arith.constant 0 : index
    %13 = vector.load %arg4[%c0_10, %c0_11] : memref<32x64xf32, #tpu.memory_space<vmem>>, vector<32x64xf32>
    %14 = vector.broadcast %12 : vector<32x1xf32> to vector<32x64xf32>
    %15 = arith.mulf %13, %14 : vector<32x64xf32>
    %cst_12 = arith.constant dense<0.000000e+00> : vector<64xf32>
    %16 = vector.multi_reduction <add>, %15, %cst_12 [0] : vector<32x64xf32> to vector<64xf32>
    %17 = vector.shape_cast %16 : vector<64xf32> to vector<1x64xf32>
    %18 = vector.extract_strided_slice %11 {offsets = [32, 0], sizes = [32, 1], strides = [1, 1]} : vector<128x1xf32> to vector<32x1xf32>
    %c0_13 = arith.constant 0 : index
    %c0_14 = arith.constant 0 : index
    %19 = vector.load %arg4[%c0_13, %c0_14] : memref<32x64xf32, #tpu.memory_space<vmem>>, vector<32x64xf32>
    %20 = vector.broadcast %18 : vector<32x1xf32> to vector<32x64xf32>
    %21 = arith.mulf %19, %20 : vector<32x64xf32>
    %cst_15 = arith.constant dense<0.000000e+00> : vector<64xf32>
    %22 = vector.multi_reduction <add>, %21, %cst_15 [0] : vector<32x64xf32> to vector<64xf32>
    %23 = vector.shape_cast %22 : vector<64xf32> to vector<1x64xf32>
    %24 = vector.extract_strided_slice %11 {offsets = [64, 0], sizes = [32, 1], strides = [1, 1]} : vector<128x1xf32> to vector<32x1xf32>
    %c0_16 = arith.constant 0 : index
    %c0_17 = arith.constant 0 : index
    %25 = vector.load %arg4[%c0_16, %c0_17] : memref<32x64xf32, #tpu.memory_space<vmem>>, vector<32x64xf32>
    %26 = vector.broadcast %24 : vector<32x1xf32> to vector<32x64xf32>
    %27 = arith.mulf %25, %26 : vector<32x64xf32>
    %cst_18 = arith.constant dense<0.000000e+00> : vector<64xf32>
    %28 = vector.multi_reduction <add>, %27, %cst_18 [0] : vector<32x64xf32> to vector<64xf32>
    %29 = vector.shape_cast %28 : vector<64xf32> to vector<1x64xf32>
    %30 = vector.extract_strided_slice %11 {offsets = [96, 0], sizes = [32, 1], strides = [1, 1]} : vector<128x1xf32> to vector<32x1xf32>
    %c0_19 = arith.constant 0 : index
    %c0_20 = arith.constant 0 : index
    %31 = vector.load %arg4[%c0_19, %c0_20] : memref<32x64xf32, #tpu.memory_space<vmem>>, vector<32x64xf32>
    %32 = vector.broadcast %30 : vector<32x1xf32> to vector<32x64xf32>
    %33 = arith.mulf %31, %32 : vector<32x64xf32>
    %cst_21 = arith.constant dense<0.000000e+00> : vector<64xf32>
    %34 = vector.multi_reduction <add>, %33, %cst_21 [0] : vector<32x64xf32> to vector<64xf32>
    %35 = vector.shape_cast %34 : vector<64xf32> to vector<1x64xf32>
    %36 = tpu.concatenate %17, %23, %29, %35 in 0 : vector<1x64xf32>, vector<1x64xf32>, vector<1x64xf32>, vector<1x64xf32> -> vector<4x64xf32>
    %37 = vector.extract_strided_slice %36 {offsets = [0, 0], sizes = [2, 64], strides = [1, 1]} : vector<4x64xf32> to vector<2x64xf32>
    %38 = vector.extract_strided_slice %36 {offsets = [2, 0], sizes = [2, 64], strides = [1, 1]} : vector<4x64xf32> to vector<2x64xf32>
    %39 = arith.mulf %37, %38 : vector<2x64xf32>
    %cst_22 = arith.constant dense<0.000000e+00> : vector<2xf32>
    %40 = vector.multi_reduction <add>, %39, %cst_22 [1] : vector<2x64xf32> to vector<2xf32>
    %41 = vector.shape_cast %40 : vector<2xf32> to vector<2x1xf32>
    %42 = arith.mulf %37, %37 : vector<2x64xf32>
    %cst_23 = arith.constant dense<0.000000e+00> : vector<2xf32>
    %43 = vector.multi_reduction <add>, %42, %cst_23 [1] : vector<2x64xf32> to vector<2xf32>
    %44 = vector.shape_cast %43 : vector<2xf32> to vector<2x1xf32>
    %45 = math.sqrt %44 : vector<2x1xf32>
    %cst_24 = arith.constant 9.99999993E-9 : f32
    %46 = vector.broadcast %cst_24 : f32 to vector<2x1xf32>
    %47 = arith.maximumf %45, %46 : vector<2x1xf32>
    %48 = arith.mulf %38, %38 : vector<2x64xf32>
    %cst_25 = arith.constant dense<0.000000e+00> : vector<2xf32>
    %49 = vector.multi_reduction <add>, %48, %cst_25 [1] : vector<2x64xf32> to vector<2xf32>
    %50 = vector.shape_cast %49 : vector<2xf32> to vector<2x1xf32>
    %51 = math.sqrt %50 : vector<2x1xf32>
    %cst_26 = arith.constant 9.99999993E-9 : f32
    %52 = vector.broadcast %cst_26 : f32 to vector<2x1xf32>
    %53 = arith.maximumf %51, %52 : vector<2x1xf32>
    %54 = arith.mulf %47, %53 : vector<2x1xf32>
    %55 = arith.divf %41, %54 : vector<2x1xf32>
    %cst_27 = arith.constant 1.000000e+00 : f32
    %56 = vector.broadcast %cst_27 : f32 to vector<2x1xf32>
    %57 = arith.subf %56, %55 : vector<2x1xf32>
    %58 = vector.shape_cast %57 : vector<2x1xf32> to vector<1x2x1xf32>
    %cst_28 = arith.constant dense<0.000000e+00> : vector<1xf32>
    %59 = vector.multi_reduction <add>, %58, %cst_28 [1, 2] : vector<1x2x1xf32> to vector<1xf32>
    %60 = vector.shape_cast %59 : vector<1xf32> to vector<1x1x1xf32>
    %61 = vector.extract %60[0, 0, 0] : f32 from vector<1x1x1xf32>
    %cst_29 = arith.constant 2.000000e+00 : f32
    %62 = arith.divf %61, %cst_29 : f32
    %c0_30 = arith.constant 0 : index
    %c0_31 = arith.constant 0 : index
    %63 = memref.load %arg5[%c0_30, %c0_31] : memref<1x1xf32, #tpu.memory_space<smem>>
    memref.store %62, %arg5[%c0_30, %c0_31] : memref<1x1xf32, #tpu.memory_space<smem>>
    return
  }
}

</mosaic_0001>

<bundles_post_ra>
// kernel: vggface2_loss.1
= control target key start
LH: loop header
LB: loop body
LE: loop exit
PB: predicated region body
PF: predicated region fallthrough
CT: control target
= control target key end

     0   :  { %10 = vsyncpa [#allocation3], 0  ;;  %s870_s0 = inlined_call_operand.vmem [shape: f32[12,256], index: 0, kind: input, shape index: {}]   ;;  %s871_s1 = inlined_call_operand.hbm [shape: f32[256,256], index: 1, kind: input, shape index: {}]   ;;  %s872_s2 = inlined_call_operand.vmem [shape: f32[12,1], index: 2, kind: input, shape index: {}]   ;;  %s873_s3 = inlined_call_operand.vmem [shape: f32[128,12], index: 3, kind: input, shape index: {}]   ;;  %s874_s4 = inlined_call_operand.vmem [shape: f32[32,64], index: 4, kind: input, shape index: {}]   ;;  %s875_s5 = inlined_call_operand.hbm [shape: f32[1,1], index: 5, kind: output, shape index: {}]  }
   0x1   :  { %11 = vsyncpa [#allocation4], 0  ;;  %s718_s18 = smov [#allocation2]  }
   0x2   :  { %s19_s19 = sshll.u32 %s718_s18, 4  ;;  %s20_s19 = int_to_ptr.vmem [resolvable:$true] %s19_s19 }
   0x3   :  { %s694_s20 = scalar_lea.vmem %s20_s19, 8192  ;;  %p699_p1 = scmp.lt.s32.totalorder %s20_s19, %s20_s19 }
   0x4   :  { %p695_p0 = scmp.ne.s32.totalorder %s20_s19, %s694_s20  ;;  %p700_p2 = scmp.lt.s32.totalorder %s694_s20, %s694_s20 }
   0x6   :  { %p701_p3 = por %p700_p2, %p699_p1 }
   0x8   :  { %p702_p4 = pnand %p701_p3, %p695_p0 }
   0xa   :  { %705 = shalt.err (!%p702_p4)
}
   0xb   :  { %s719_s21 = smov 256   ;;  %s720_s22 = smov 16  }
   0xc   :  { %25 = dma.hbm_to_vmem [thread:$0]  %s871_s1, 8192, %s20_s19, [#allocation3], %s719_s21, %s719_s21, %s720_s22  }
   0xd   :  { %714 = dma.done.wait [#allocation3], 8192  }
   0xe   :  { %715 = vsyncadd [#allocation3], 4294959104  ;;  %v721_v0 = vmov 0   ;;  %v70_v1 = vld [vmem:[#allocation2 + $0xf8] sm:$0xff]  ;;  %v69_v2 = vld [vmem:[#allocation2 + $0xf0] sm:$0xff]  ;;  %vm257_vm0 = vcmask 1043456  }
   0xf   :  { %679 = vset.pattern.permute.xlu0 %v721_v0  ;;  %v68_v3 = vld [vmem:[#allocation2 + $0xe8] sm:$0xff]  ;;  %115 = vmatprep.subr.mxu0 %v70_v1  ;;  %v67_v4 = vld [vmem:[#allocation2 + $0xe0] sm:$0xff]  ;;  %v66_v5 = vld [vmem:[#allocation2 + $0xd8] sm:$0xff]  ;;  %vm208_vm1 = vcmask 97280   ;;  %vm513_vm2 = vcmask 523264   ;;  %vm578_vm3 = vcmask 1040384  }
  0x10   :  { %116 = vmatpush1.msra.mxu0 %v69_v2  ;;  %v65_v6 = vld [vmem:[#allocation2 + $0xd0] sm:$0xff]  ;;  %v64_v7 = vld [vmem:[#allocation2 + $0xc8] sm:$0xff]  ;;  %v63_v8 = vld [vmem:[#allocation2 + $0xc0] sm:$0xff]  ;;  %vm580_vm4 = vcmask 1041408   ;;  %vm582_vm5 = vcmask 1042432   ;;  %vm604_vm6 = vcmask 519170  }
  0x11   :  { %117 = vmatprep.subr.mxu0 %v68_v3  ;;  %v62_v9 = vld [vmem:[#allocation2 + $0xb8] sm:$0xff]  ;;  %v61_v10 = vld [vmem:[#allocation2 + $0xb0] sm:$0xff]  ;;  %v60_v11 = vld [vmem:[#allocation2 + $0xa8] sm:$0xff]  ;;  %vm588_vm7 = vcmask 517120   ;;  %vm623_vm12 = vcmask 1024   ;;  %s723_s21 = smov [#allocation5]  }
  0x12   :  { %118 = vmatpush1.msra.mxu0 %v67_v4  ;;  %v59_v12 = vld [vmem:[#allocation2 + $0xa0] sm:$0xff]  ;;  %v58_v13 = vld [vmem:[#allocation2 + $0x98] sm:$0xff]  ;;  %v57_v14 = vld [vmem:[#allocation2 + $0x90] sm:$0xff] }
  0x13   :  { %119 = vmatprep.subr.mxu0 %v66_v5  ;;  %v56_v15 = vld [vmem:[#allocation2 + $0x88] sm:$0xff]  ;;  %v55_v16 = vld [vmem:[#allocation2 + $0x80] sm:$0xff]  ;;  %v54_v17 = vld [vmem:[#allocation2 + $0x78] sm:$0xff] }
  0x14   :  { %120 = vmatpush1.msra.mxu0 %v65_v6  ;;  %v53_v18 = vld [vmem:[#allocation2 + $0x70] sm:$0xff]  ;;  %v52_v19 = vld [vmem:[#allocation2 + $0x68] sm:$0xff]  ;;  %v51_v20 = vld [vmem:[#allocation2 + $0x60] sm:$0xff] }
  0x15   :  { %121 = vmatprep.subr.mxu0 %v64_v7  ;;  %v50_v21 = vld [vmem:[#allocation2 + $0x58] sm:$0xff]  ;;  %v49_v22 = vld [vmem:[#allocation2 + $0x50] sm:$0xff]  ;;  %v48_v23 = vld [vmem:[#allocation2 + $0x48] sm:$0xff]  ;;  %v722_v7 = vmov 0.0  }
  0x16   :  { %122 = vmatpush1.msra.mxu0 %v63_v8  ;;  %v47_v24 = vld [vmem:[#allocation2 + $0x40] sm:$0xff]  ;;  %v36_v25 = vld [vmem:[%s870_s0 + $0x8] sm:$0xff]  ;;  %v46_v26 = vld [vmem:[#allocation2 + $0x38] sm:$0xff]  ;;  %328 = vmatprep.mubr.f32.mxu1 %v722_v7 }
  0x17   :  { %123 = vmatprep.subr.mxu0 %v62_v9  ;;  %179 = vmatprep.mubr.f32.mxu0 %v36_v25  ;;  %v104_v27 = vld [vmem:[%s872_s2 + $0x8] sm:$0xf]  ;;  %v45_v28 = vld [vmem:[#allocation2 + $0x30] sm:$0xff]  ;;  %v103_v30 = vld [vmem:[%s872_s2] sm:$0xff] }
  0x18   :  { %124 = vmatpush1.msra.mxu0 %v61_v10  ;;  %112 = vperm.xlu0 %679, %v104_v27   ;;  %v44_v29 = vld [vmem:[#allocation2 + $0x28] sm:$0xff]  ;;  %v43_v31 = vld [vmem:[#allocation2 + $0x20] sm:$0xff]  ;;  %v42_v32 = vld [vmem:[#allocation2 + $0x18] sm:$0xff] }
  0x19   :  { %125 = vmatprep.subr.mxu0 %v60_v11  ;;  %v41_v33 = vld [vmem:[#allocation2 + $0x10] sm:$0xff]  ;;  %v40_v34 = vld [vmem:[#allocation2 + $0x8] sm:$0xff]  ;;  %v39_v35 = vld [vmem:[#allocation2] sm:$0xff] }
  0x1a   :  { %126 = vmatpush1.msra.mxu0 %v59_v12  ;;  %v102_v36 = vld [vmem:[#allocation2 + $0x1f8] sm:$0xff]  ;;  %v101_v37 = vld [vmem:[#allocation2 + $0x1f0] sm:$0xff]  ;;  %v100_v38 = vld [vmem:[#allocation2 + $0x1e8] sm:$0xff] }
  0x1b   :  { %127 = vmatprep.subr.mxu0 %v58_v13  ;;  %v99_v39 = vld [vmem:[#allocation2 + $0x1e0] sm:$0xff]  ;;  %v98_v40 = vld [vmem:[#allocation2 + $0x1d8] sm:$0xff]  ;;  %v97_v41 = vld [vmem:[#allocation2 + $0x1d0] sm:$0xff] }
  0x1c   :  { %128 = vmatpush1.msra.mxu0 %v57_v14  ;;  %107 = vperm.xlu0 %679, %v103_v30   ;;  %v96_v42 = vld [vmem:[#allocation2 + $0x1c8] sm:$0xff]  ;;  %v95_v43 = vld [vmem:[#allocation2 + $0x1c0] sm:$0xff]  ;;  %v94_v44 = vld [vmem:[#allocation2 + $0x1b8] sm:$0xff] }
  0x1d   :  { %129 = vmatprep.subr.mxu0 %v56_v15  ;;  %v93_v45 = vld [vmem:[#allocation2 + $0x1b0] sm:$0xff]  ;;  %v92_v46 = vld [vmem:[#allocation2 + $0x1a8] sm:$0xff]  ;;  %v91_v47 = vld [vmem:[#allocation2 + $0x1a0] sm:$0xff] }
  0x1e   :  { %130 = vmatpush1.msra.mxu0 %v55_v16  ;;  %v90_v48 = vld [vmem:[#allocation2 + $0x198] sm:$0xff]  ;;  %v89_v49 = vld [vmem:[#allocation2 + $0x190] sm:$0xff]  ;;  %v88_v50 = vld [vmem:[#allocation2 + $0x188] sm:$0xff] }
  0x1f   :  { %131 = vmatprep.subr.mxu0 %v54_v17  ;;  %v87_v51 = vld [vmem:[#allocation2 + $0x180] sm:$0xff]  ;;  %v86_v52 = vld [vmem:[#allocation2 + $0x178] sm:$0xff]  ;;  %v85_v53 = vld [vmem:[#allocation2 + $0x170] sm:$0xff] }
  0x20   :  { %132 = vmatpush1.msra.mxu0 %v53_v18  ;;  %v84_v54 = vld [vmem:[#allocation2 + $0x168] sm:$0xff]  ;;  %v83_v55 = vld [vmem:[#allocation2 + $0x160] sm:$0xff]  ;;  %v82_v56 = vld [vmem:[#allocation2 + $0x158] sm:$0xff] }
  0x21   :  { %133 = vmatprep.subr.mxu0 %v52_v19  ;;  %v81_v57 = vld [vmem:[#allocation2 + $0x150] sm:$0xff]  ;;  %v80_v58 = vld [vmem:[#allocation2 + $0x148] sm:$0xff]  ;;  %v79_v59 = vld [vmem:[#allocation2 + $0x140] sm:$0xff] }
  0x22   :  { %134 = vmatpush1.msra.mxu0 %v51_v20  ;;  %v78_v60 = vld [vmem:[#allocation2 + $0x138] sm:$0xff]  ;;  %v77_v61 = vld [vmem:[#allocation2 + $0x130] sm:$0xff]  ;;  %v76_v62 = vld [vmem:[#allocation2 + $0x128] sm:$0xff] }
  0x23   :  { %135 = vmatprep.subr.mxu0 %v50_v21  ;;  %v75_v63 = vld [vmem:[#allocation2 + $0x120] sm:$0xff]  ;;  %v74_v0 = vld [vmem:[#allocation2 + $0x118] sm:$0xff]  ;;  %v73_v1 = vld [vmem:[#allocation2 + $0x110] sm:$0xff] }
  0x24   :  { %136 = vmatpush1.msra.mxu0 %v49_v22  ;;  %v72_v2 = vld [vmem:[#allocation2 + $0x108] sm:$0xff]  ;;  %v71_v3 = vld [vmem:[#allocation2 + $0x100] sm:$0xff]  ;;  %v38_v5 = vld [vmem:[%s870_s0 + $0x18] sm:$0xf] }
  0x25   :  { %137 = vmatprep.subr.mxu0 %v48_v23  ;;  %v35_v4 = vld [vmem:[%s870_s0] sm:$0xff]  ;;  %v37_v6 = vld [vmem:[%s870_s0 + $0x10] sm:$0xf]  ;;  %v193_v19 = vld [vmem:[%s873_s3 + $0x8] sm:$0xff] }
  0x26   :  { %138 = vmatpush1.msra.mxu0 %v47_v24  ;;  %v192_v18 = vld [vmem:[%s873_s3] sm:$0xff]  ;;  %v194_v20 = vld [vmem:[%s873_s3 + $0x10] sm:$0xff]  ;;  %v195_v21 = vld [vmem:[%s873_s3 + $0x18] sm:$0xff] }
  0x27   :  { %139 = vmatprep.subr.mxu0 %v46_v26  ;;  %v196_v22 = vld [vmem:[%s873_s3 + $0x20] sm:$0xff]  ;;  %v197_v23 = vld [vmem:[%s873_s3 + $0x28] sm:$0xff]  ;;  %v198_v24 = vld [vmem:[%s873_s3 + $0x30] sm:$0xff] }
  0x28   :  { %140 = vmatpush1.msra.mxu0 %v45_v28  ;;  %v199_v25 = vld [vmem:[%s873_s3 + $0x38] sm:$0xff]  ;;  %v200_v26 = vld [vmem:[%s873_s3 + $0x40] sm:$0xff]  ;;  %v201_v27 = vld [vmem:[%s873_s3 + $0x48] sm:$0xff] }
  0x29   :  { %141 = vmatprep.subr.mxu0 %v44_v29  ;;  %v202_v28 = vld [vmem:[%s873_s3 + $0x50] sm:$0xff]  ;;  %v203_v29 = vld [vmem:[%s873_s3 + $0x58] sm:$0xff]  ;;  %v204_v30 = vld [vmem:[%s873_s3 + $0x60] sm:$0xff] }
  0x2a   :  { %142 = vmatpush1.msra.mxu0 %v43_v31  ;;  %v205_v31 = vld [vmem:[%s873_s3 + $0x68] sm:$0xff] }
  0x2b   :  { %143 = vmatprep.subr.mxu0 %v42_v32  ;;  %v206_v32 = vld [vmem:[%s873_s3 + $0x70] sm:$0xff] }
  0x2c   :  { %144 = vmatpush1.msra.mxu0 %v41_v33  ;;  %v207_v33 = vld [vmem:[%s873_s3 + $0x78] sm:$0xff] }
  0x2d   :  { %145 = vmatprep.subr.mxu0 %v40_v34 }
  0x2e   :  { %146 = vmatpush1.msra.mxu0 %v39_v35 }
  0x2f   :  { %147 = vmatprep.subr.mxu0 %v102_v36 }
  0x30   :  { %148 = vmatpush2.msra.mxu0 %v101_v37 }
  0x31   :  { %149 = vmatprep.subr.mxu0 %v100_v38 }
  0x32   :  { %150 = vmatpush2.msra.mxu0 %v99_v39 }
  0x33   :  { %151 = vmatprep.subr.mxu0 %v98_v40 }
  0x34   :  { %152 = vmatpush2.msra.mxu0 %v97_v41 }
  0x35   :  { %153 = vmatprep.subr.mxu0 %v96_v42 }
  0x36   :  { %154 = vmatpush2.msra.mxu0 %v95_v43 }
  0x37   :  { %155 = vmatprep.subr.mxu0 %v94_v44 }
  0x38   :  { %156 = vmatpush2.msra.mxu0 %v93_v45 }
  0x39   :  { %157 = vmatprep.subr.mxu0 %v92_v46 }
  0x3a   :  { %158 = vmatpush2.msra.mxu0 %v91_v47 }
  0x3b   :  { %159 = vmatprep.subr.mxu0 %v90_v48 }
  0x3c   :  { %160 = vmatpush2.msra.mxu0 %v89_v49 }
  0x3d   :  { %161 = vmatprep.subr.mxu0 %v88_v50 }
  0x3e   :  { %162 = vmatpush2.msra.mxu0 %v87_v51 }
  0x3f   :  { %163 = vmatprep.subr.mxu0 %v86_v52 }
  0x40   :  { %164 = vmatpush2.msra.mxu0 %v85_v53 }
  0x41   :  { %165 = vmatprep.subr.mxu0 %v84_v54 }
  0x42   :  { %166 = vmatpush2.msra.mxu0 %v83_v55 }
  0x43   :  { %167 = vmatprep.subr.mxu0 %v82_v56 }
  0x44   :  { %168 = vmatpush2.msra.mxu0 %v81_v57 }
  0x45   :  { %169 = vmatprep.subr.mxu0 %v80_v58 }
  0x46   :  { %170 = vmatpush2.msra.mxu0 %v79_v59 }
  0x47   :  { %171 = vmatprep.subr.mxu0 %v78_v60 }
  0x48   :  { %172 = vmatpush2.msra.mxu0 %v77_v61 }
  0x49   :  { %173 = vmatprep.subr.mxu0 %v76_v62 }
  0x4a   :  { %174 = vmatpush2.msra.mxu0 %v75_v63 }
  0x4b   :  { %175 = vmatprep.subr.mxu0 %v74_v0 }
  0x4c   :  { %176 = vmatpush2.msra.mxu0 %v73_v1 }
  0x4d   :  { %177 = vmatprep.subr.mxu0 %v72_v2 }
  0x4e   :  { %178 = vmatpush2.msra.mxu0 %v71_v3 }
  0x4f   :  { %180 = vmatmul.mubr.f32.vlgmr.msra.gmra.mxu0 %v35_v4 }
  0x50   :  { %185 = vmatprep.mubr.f32.mxu0 %v38_v5 }
  0x53   :  { %186 = vmatmul.mubr.f32.gmra.mxu0 %v37_v6 }
  0x93   :  { %v113_v9 = vpop.permute.xlu0 %112 }
  0x97   :  { %v108_v13 = vpop.permute.xlu0 %107 }
 0x10f   :  { %v181_v8 = vpop.f32.mrf.mxu0 }
 0x110   :  { %v182_v17 = vadd.f32 %v181_v8, %v108_v13 }
 0x111   :  { %v183_v10 = vpop.f32.mrf.mxu0 }
 0x112   :  { %v184_v16 = vadd.f32 %v183_v10, %v108_v13 }
 0x113   :  { %v187_v11 = vpop.f32.mrf.mxu0 }
 0x114   :  { %v188_v15 = vadd.f32 %v187_v11, %v113_v9 }
 0x115   :  { %v189_v12 = vpop.f32.mrf.mxu0 }
 0x116   :  { %v190_v14 = vadd.f32 %v189_v12, %v113_v9 }
 0x118   :  { %653 = vmatprep.subr.msk.mxu1 %vm257_vm0, %v190_v14 }
 0x119   :  { %654 = vmatpush1.msk.msra.mxu1 %vm257_vm0, %v188_v15 }
 0x11a   :  { %294 = vmatprep.subr.mxu1 %v184_v16 }
 0x11b   :  { %295 = vmatpush1.msra.mxu1 %v182_v17 }
 0x11c   :  { %655 = vmatmul.mubr.msk.f32.vlgmr.msra.gmra.mxu1 %vm208_vm1, %v192_v18 }
 0x11d   :  { %334 = vmatprep.mubr.f32.mxu1 %v722_v7 }
 0x120   :  { %656 = vmatmul.mubr.msk.f32.gmra.mxu1 %vm208_vm1, %v193_v19 }
 0x121   :  { %340 = vmatprep.mubr.f32.mxu1 %v722_v7 }
 0x124   :  { %657 = vmatmul.mubr.msk.f32.gmra.mxu1 %vm208_vm1, %v194_v20 }
 0x125   :  { %346 = vmatprep.mubr.f32.mxu1 %v722_v7 }
 0x128   :  { %658 = vmatmul.mubr.msk.f32.gmra.mxu1 %vm208_vm1, %v195_v21 }
 0x129   :  { %352 = vmatprep.mubr.f32.mxu1 %v722_v7 }
 0x12c   :  { %659 = vmatmul.mubr.msk.f32.gmra.mxu1 %vm208_vm1, %v196_v22 }
 0x12d   :  { %358 = vmatprep.mubr.f32.mxu1 %v722_v7 }
 0x130   :  { %660 = vmatmul.mubr.msk.f32.gmra.mxu1 %vm208_vm1, %v197_v23 }
 0x131   :  { %364 = vmatprep.mubr.f32.mxu1 %v722_v7 }
 0x134   :  { %661 = vmatmul.mubr.msk.f32.gmra.mxu1 %vm208_vm1, %v198_v24 }
 0x135   :  { %370 = vmatprep.mubr.f32.mxu1 %v722_v7 }
 0x138   :  { %662 = vmatmul.mubr.msk.f32.gmra.mxu1 %vm208_vm1, %v199_v25 }
 0x139   :  { %376 = vmatprep.mubr.f32.mxu1 %v722_v7 }
 0x13c   :  { %663 = vmatmul.mubr.msk.f32.gmra.mxu1 %vm208_vm1, %v200_v26 }
 0x13d   :  { %382 = vmatprep.mubr.f32.mxu1 %v722_v7 }
 0x140   :  { %664 = vmatmul.mubr.msk.f32.gmra.mxu1 %vm208_vm1, %v201_v27 }
 0x141   :  { %388 = vmatprep.mubr.f32.mxu1 %v722_v7 }
 0x144   :  { %665 = vmatmul.mubr.msk.f32.gmra.mxu1 %vm208_vm1, %v202_v28 }
 0x145   :  { %394 = vmatprep.mubr.f32.mxu1 %v722_v7 }
 0x148   :  { %666 = vmatmul.mubr.msk.f32.gmra.mxu1 %vm208_vm1, %v203_v29 }
 0x149   :  { %400 = vmatprep.mubr.f32.mxu1 %v722_v7 }
 0x14c   :  { %667 = vmatmul.mubr.msk.f32.gmra.mxu1 %vm208_vm1, %v204_v30 }
 0x14d   :  { %406 = vmatprep.mubr.f32.mxu1 %v722_v7 }
 0x150   :  { %668 = vmatmul.mubr.msk.f32.gmra.mxu1 %vm208_vm1, %v205_v31 }
 0x151   :  { %412 = vmatprep.mubr.f32.mxu1 %v722_v7 }
 0x154   :  { %669 = vmatmul.mubr.msk.f32.gmra.mxu1 %vm208_vm1, %v206_v32 }
 0x155   :  { %418 = vmatprep.mubr.f32.mxu1 %v722_v7 }
 0x158   :  { %670 = vmatmul.mubr.msk.f32.gmra.mxu1 %vm208_vm1, %v207_v33 }
 0x1dc   :  { %v330_v34 = vpop.f32.mrf.mxu1 }
 0x1dd   :  { %v425_v36 = vmax.f32 %v330_v34, 0.0 }
 0x1de   :  { %v332_v35 = vpop.f32.mrf.mxu1 }
 0x1df   :  { %v426_v37 = vmax.f32 %v332_v35, 0.0 }
 0x1e0   :  { %v336_v38 = vpop.f32.mrf.mxu1 }
 0x1e1   :  { %v457_v39 = vadd.f32 %v426_v37, %v425_v36  ;;  %v427_v41 = vmax.f32 %v336_v38, 0.0 }
 0x1e2   :  { %v338_v40 = vpop.f32.mrf.mxu1 }
 0x1e3   :  { %v428_v42 = vmax.f32 %v338_v40, 0.0  ;;  %458 = vadd.xlane.f32.xlu1 %v457_v39 }
 0x1e4   :  { %v342_v43 = vpop.f32.mrf.mxu1 }
 0x1e5   :  { %v460_v44 = vadd.f32 %v428_v42, %v427_v41  ;;  %v429_v46 = vmax.f32 %v342_v43, 0.0 }
 0x1e6   :  { %v344_v45 = vpop.f32.mrf.mxu1 }
 0x1e7   :  { %v430_v47 = vmax.f32 %v344_v45, 0.0  ;;  %461 = vadd.xlane.f32.xlu1 %v460_v44 }
 0x1e8   :  { %v348_v48 = vpop.f32.mrf.mxu1 }
 0x1e9   :  { %v463_v49 = vadd.f32 %v430_v47, %v429_v46  ;;  %v431_v51 = vmax.f32 %v348_v48, 0.0 }
 0x1ea   :  { %v350_v50 = vpop.f32.mrf.mxu1 }
 0x1eb   :  { %v432_v52 = vmax.f32 %v350_v50, 0.0  ;;  %464 = vadd.xlane.f32.xlu1 %v463_v49 }
 0x1ec   :  { %v354_v53 = vpop.f32.mrf.mxu1 }
 0x1ed   :  { %v466_v54 = vadd.f32 %v432_v52, %v431_v51  ;;  %v433_v56 = vmax.f32 %v354_v53, 0.0 }
 0x1ee   :  { %v356_v55 = vpop.f32.mrf.mxu1 }
 0x1ef   :  { %v434_v57 = vmax.f32 %v356_v55, 0.0  ;;  %467 = vadd.xlane.f32.xlu0 %v466_v54 }
 0x1f0   :  { %v360_v58 = vpop.f32.mrf.mxu1 }
 0x1f1   :  { %v469_v59 = vadd.f32 %v434_v57, %v433_v56  ;;  %v435_v61 = vmax.f32 %v360_v58, 0.0  ;;  %v506_v58 = vld [vmem:[%s874_s4 + $0x8] sm:$0xff] }
 0x1f2   :  { %v362_v60 = vpop.f32.mrf.mxu1 }
 0x1f3   :  { %v436_v62 = vmax.f32 %v362_v60, 0.0  ;;  %470 = vadd.xlane.f32.xlu0 %v469_v59 }
 0x1f4   :  { %v366_v63 = vpop.f32.mrf.mxu1 }
 0x1f5   :  { %v472_v0 = vadd.f32 %v436_v62, %v435_v61  ;;  %v437_v2 = vmax.f32 %v366_v63, 0.0  ;;  %v505_v61 = vld [vmem:[%s874_s4] sm:$0xff]  ;;  %v507_v62 = vld [vmem:[%s874_s4 + $0x10] sm:$0xff] }
 0x1f6   :  { %v368_v1 = vpop.f32.mrf.mxu1 }
 0x1f7   :  { %v438_v3 = vmax.f32 %v368_v1, 0.0  ;;  %473 = vadd.xlane.f32.xlu1 %v472_v0 }
 0x1f8   :  { %v372_v4 = vpop.f32.mrf.mxu1 }
 0x1f9   :  { %v475_v5 = vadd.f32 %v438_v3, %v437_v2  ;;  %v439_v7 = vmax.f32 %v372_v4, 0.0  ;;  %v508_v3 = vld [vmem:[%s874_s4 + $0x18] sm:$0xff] }
 0x1fa   :  { %v374_v6 = vpop.f32.mrf.mxu1 }
 0x1fb   :  { %v440_v8 = vmax.f32 %v374_v6, 0.0  ;;  %476 = vadd.xlane.f32.xlu1 %v475_v5 }
 0x1fc   :  { %v378_v9 = vpop.f32.mrf.mxu1 }
 0x1fd   :  { %v478_v10 = vadd.f32 %v440_v8, %v439_v7  ;;  %v441_v12 = vmax.f32 %v378_v9, 0.0 }
 0x1fe   :  { %v380_v11 = vpop.f32.mrf.mxu1 }
 0x1ff   :  { %v442_v13 = vmax.f32 %v380_v11, 0.0  ;;  %479 = vadd.xlane.f32.xlu1 %v478_v10 }
 0x200   :  { %v384_v14 = vpop.f32.mrf.mxu1 }
 0x201   :  { %v481_v15 = vadd.f32 %v442_v13, %v441_v12  ;;  %v443_v17 = vmax.f32 %v384_v14, 0.0 }
 0x202   :  { %v386_v16 = vpop.f32.mrf.mxu1 }
 0x203   :  { %v444_v18 = vmax.f32 %v386_v16, 0.0  ;;  %482 = vadd.xlane.f32.xlu1 %v481_v15 }
 0x204   :  { %v390_v19 = vpop.f32.mrf.mxu1 }
 0x205   :  { %v484_v20 = vadd.f32 %v444_v18, %v443_v17  ;;  %v445_v22 = vmax.f32 %v390_v19, 0.0 }
 0x206   :  { %v392_v21 = vpop.f32.mrf.mxu1 }
 0x207   :  { %v446_v23 = vmax.f32 %v392_v21, 0.0  ;;  %485 = vadd.xlane.f32.xlu1 %v484_v20 }
 0x208   :  { %v396_v24 = vpop.f32.mrf.mxu1 }
 0x209   :  { %v487_v25 = vadd.f32 %v446_v23, %v445_v22  ;;  %v447_v40 = vmax.f32 %v396_v24, 0.0 }
 0x20a   :  { %v398_v26 = vpop.f32.mrf.mxu1 }
 0x20b   :  { %488 = vadd.xlane.f32.xlu1 %v487_v25  ;;  %v448_v37 = vmax.f32 %v398_v26, 0.0 }
 0x20c   :  { %v402_v27 = vpop.f32.mrf.mxu1 }
 0x20d   :  { %v449_v29 = vmax.f32 %v402_v27, 0.0  ;;  %v490_v44 = vadd.f32 %v448_v37, %v447_v40 }
 0x20e   :  { %v404_v28 = vpop.f32.mrf.mxu1 }
 0x20f   :  { %v450_v30 = vmax.f32 %v404_v28, 0.0 }
 0x210   :  { %v408_v31 = vpop.f32.mrf.mxu1 }
 0x211   :  { %v493_v32 = vadd.f32 %v450_v30, %v449_v29  ;;  %v451_v34 = vmax.f32 %v408_v31, 0.0 }
 0x212   :  { %v410_v33 = vpop.f32.mrf.mxu1 }
 0x213   :  { %v452_v35 = vmax.f32 %v410_v33, 0.0  ;;  %494 = vadd.xlane.f32.xlu1 %v493_v32 }
 0x214   :  { %v414_v36 = vpop.f32.mrf.mxu1 }
 0x215   :  { %v496_v38 = vadd.f32 %v452_v35, %v451_v34  ;;  %v453_v41 = vmax.f32 %v414_v36, 0.0 }
 0x216   :  { %v416_v39 = vpop.f32.mrf.mxu1 }
 0x217   :  { %v454_v42 = vmax.f32 %v416_v39, 0.0  ;;  %497 = vadd.xlane.f32.xlu1 %v496_v38 }
 0x218   :  { %v420_v43 = vpop.f32.mrf.mxu1 }
 0x219   :  { %v499_v45 = vadd.f32 %v454_v42, %v453_v41  ;;  %v455_v47 = vmax.f32 %v420_v43, 0.0 }
 0x21a   :  { %v422_v46 = vpop.f32.mrf.mxu1 }
 0x21b   :  { %v456_v48 = vmax.f32 %v422_v46, 0.0  ;;  %491 = vadd.xlane.f32.xlu1 %v490_v44  ;;  %500 = vadd.xlane.f32.xlu0 %v499_v45 }
 0x21d   :  { %v502_v49 = vadd.f32 %v456_v48, %v455_v47 }
 0x21f   :  { %503 = vadd.xlane.f32.xlu0 %v502_v49 }
 0x26c   :  { %v459_v50 = vpop.xlane.xlu1 %458 }
 0x26d   :  { %v509_v4 = vmul.f32 %v505_v61, %v459_v50 }
 0x26f   :  { %v514_v14 = vsel %vm513_vm2, %v509_v4, 0.0 }
 0x270   :  { %v462_v51 = vpop.xlane.xlu1 %461 }
 0x271   :  { %v510_v0 = vmul.f32 %v506_v58, %v462_v51 }
 0x273   :  { %v515_v8 = vsel %vm513_vm2, %v510_v0, 0.0 }
 0x274   :  { %v465_v52 = vpop.xlane.xlu1 %464  ;;  %v516_v17 = vadd.f32 %v515_v8, %v514_v14 }
 0x275   :  { %v511_v5 = vmul.f32 %v507_v62, %v465_v52 }
 0x277   :  { %v517_v15 = vsel %vm513_vm2, %v511_v5, 0.0 }
 0x278   :  { %v468_v56 = vpop.xlane.xlu0 %467  ;;  %v518_v20 = vadd.f32 %v517_v15, %v516_v17 }
 0x279   :  { %v512_v9 = vmul.f32 %v508_v3, %v468_v56 }
 0x27b   :  { %v519_v19 = vsel %vm513_vm2, %v512_v9, 0.0 }
 0x27c   :  { %v471_v59 = vpop.xlane.xlu0 %470  ;;  %v520_v24 = vadd.f32 %v519_v19, %v518_v20 }
 0x27d   :  { %v527_v1 = vmul.f32 %v505_v61, %v471_v59 }
 0x27e   :  { %v521_v31 = vrot.slane %v520_v24, 4 }
 0x27f   :  { %v531_v10 = vsel %vm513_vm2, %v527_v1, 0.0 }
 0x280   :  { %v474_v53 = vpop.xlane.xlu1 %473  ;;  %v522_v42 = vadd.f32 %v521_v31, %v520_v24 }
 0x281   :  { %v528_v60 = vmul.f32 %v506_v58, %v474_v53 }
 0x282   :  { %v523_v52 = vrot.slane %v522_v42, 2 }
 0x283   :  { %v532_v6 = vsel %vm513_vm2, %v528_v60, 0.0 }
 0x284   :  { %v477_v54 = vpop.xlane.xlu1 %476  ;;  %v533_v12 = vadd.f32 %v532_v6, %v531_v10  ;;  %v524_v59 = vadd.f32 %v523_v52, %v522_v42 }
 0x285   :  { %v529_v2 = vmul.f32 %v507_v62, %v477_v54 }
 0x286   :  { %v525_v1 = vrot.slane %v524_v59, 1 }
 0x287   :  { %v534_v11 = vsel %vm513_vm2, %v529_v2, 0.0 }
 0x288   :  { %v480_v55 = vpop.xlane.xlu1 %479  ;;  %v535_v18 = vadd.f32 %v534_v11, %v533_v12 }
 0x289   :  { %v530_v7 = vmul.f32 %v508_v3, %v480_v55 }
 0x28b   :  { %v536_v16 = vsel %vm513_vm2, %v530_v7, 0.0  ;;  %v526_v7 = vadd.f32 %v525_v1, %v524_v59 }
 0x28c   :  { %v483_v57 = vpop.xlane.xlu1 %482  ;;  %v537_v21 = vadd.f32 %v536_v16, %v535_v18 }
 0x28d   :  { %v544_v25 = vmul.f32 %v505_v61, %v483_v57 }
 0x28e   :  { %v538_v27 = vrot.slane %v537_v21, 4 }
 0x28f   :  { %v548_v32 = vsel %vm513_vm2, %v544_v25, 0.0 }
 0x290   :  { %v486_v63 = vpop.xlane.xlu1 %485  ;;  %v539_v35 = vadd.f32 %v538_v27, %v537_v21 }
 0x291   :  { %v545_v23 = vmul.f32 %v506_v58, %v486_v63 }
 0x292   :  { %v540_v47 = vrot.slane %v539_v35, 2 }
 0x293   :  { %v549_v29 = vsel %vm513_vm2, %v545_v23, 0.0 }
 0x294   :  { %v489_v13 = vpop.xlane.xlu1 %488  ;;  %v550_v36 = vadd.f32 %v549_v29, %v548_v32  ;;  %v541_v56 = vadd.f32 %v540_v47, %v539_v35 }
 0x295   :  { %v546_v26 = vmul.f32 %v507_v62, %v489_v13 }
 0x297   :  { %v551_v33 = vsel %vm513_vm2, %v546_v26, 0.0 }
 0x298   :  { %v552_v43 = vadd.f32 %v551_v33, %v550_v36 }
 0x29c   :  { %v495_v22 = vpop.xlane.xlu1 %494 }
 0x29d   :  { %v561_v34 = vmul.f32 %v505_v61, %v495_v22 }
 0x29f   :  { %v565_v44 = vsel %vm513_vm2, %v561_v34, 0.0 }
 0x2a0   :  { %v498_v28 = vpop.xlane.xlu1 %497 }
 0x2a1   :  { %v562_v30 = vmul.f32 %v506_v58, %v498_v28 }
 0x2a3   :  { %v566_v39 = vsel %vm513_vm2, %v562_v30, 0.0 }
 0x2a4   :  { %v492_v37 = vpop.xlane.xlu1 %491  ;;  %v501_v38 = vpop.xlane.xlu0 %500  ;;  %v567_v48 = vadd.f32 %v566_v39, %v565_v44 }
 0x2a5   :  { %v547_v40 = vmul.f32 %v508_v3, %v492_v37  ;;  %v563_v41 = vmul.f32 %v507_v62, %v501_v38  ;;  %v542_v62 = vrot.slane %v541_v56, 1 }
 0x2a7   :  { %v553_v45 = vsel %vm513_vm2, %v547_v40, 0.0  ;;  %v568_v46 = vsel %vm513_vm2, %v563_v41, 0.0  ;;  %v543_v5 = vadd.f32 %v542_v62, %v541_v56 }
 0x2a8   :  { %v554_v49 = vadd.f32 %v553_v45, %v552_v43  ;;  %v504_v50 = vpop.xlane.xlu0 %503  ;;  %v569_v54 = vadd.f32 %v568_v46, %v567_v48 }
 0x2a9   :  { %v564_v51 = vmul.f32 %v508_v3, %v504_v50  ;;  %v579_v10 = vsel %vm578_vm3, %v526_v7, %v543_v5 }
 0x2aa   :  { %v555_v53 = vrot.slane %v554_v49, 4 }
 0x2ab   :  { %v570_v55 = vsel %vm513_vm2, %v564_v51, 0.0 }
 0x2ac   :  { %v556_v57 = vadd.f32 %v555_v53, %v554_v49  ;;  %v571_v58 = vadd.f32 %v570_v55, %v569_v54 }
 0x2ae   :  { %v557_v60 = vrot.slane %v556_v57, 2  ;;  %v572_v61 = vrot.slane %v571_v58, 4 }
 0x2b0   :  { %v558_v63 = vadd.f32 %v557_v60, %v556_v57  ;;  %v573_v0 = vadd.f32 %v572_v61, %v571_v58 }
 0x2b2   :  { %v559_v2 = vrot.slane %v558_v63, 1  ;;  %v574_v4 = vrot.slane %v573_v0, 2 }
 0x2b4   :  { %v575_v6 = vadd.f32 %v574_v4, %v573_v0  ;;  %v560_v3 = vadd.f32 %v559_v2, %v558_v63 }
 0x2b6   :  { %v576_v8 = vrot.slane %v575_v6, 1  ;;  %v581_v11 = vsel %vm580_vm4, %v579_v10, %v560_v3 }
 0x2b8   :  { %v577_v9 = vadd.f32 %v576_v8, %v575_v6 }
 0x2ba   :  { %v583_v12 = vsel %vm582_vm5, %v581_v11, %v577_v9 }
 0x2bb   :  { %v592_v13 = vmul.f32 %v583_v12, %v583_v12  ;;  %v585_v14 = vrot.slane %v583_v12, 2 }
 0x2bd   :  { %v605_v15 = vsel %vm604_vm6, %v592_v13, 0.0  ;;  %v593_v16 = vsel %vm588_vm7, %v592_v13, 0.0  ;;  %v587_v17 = vmul.f32 %v585_v14, %v583_v12 }
 0x2be   :  { %606 = vadd.xlane.f32.xlu1 %v605_v15  ;;  %594 = vadd.xlane.f32.xlu0 %v593_v16 }
 0x2bf   :  { %v589_v18 = vsel %vm588_vm7, %v587_v17, 0.0 }
 0x2c2   :  { %590 = vadd.xlane.f32.xlu1 %v589_v18 }
 0x347   :  { %v607_v19 = vpop.xlane.xlu1 %606  ;;  %v595_v20 = vpop.xlane.xlu0 %594 }
 0x348   :  { %680 = vrsqrt.f32 %v607_v19  ;;  %vm610_vm8 = vcmp.eq.f32.partialorder %v607_v19, inf  ;;  %v613_v24 = vand.u32 2147483648, %v607_v19  ;;  %vm612_vm9 = vcmp.eq.f32.partialorder %v607_v19, 0.0 }
 0x349   :  { %682 = vrsqrt.f32 %v595_v20  ;;  %vm598_vm10 = vcmp.eq.f32.partialorder %v595_v20, inf  ;;  %v601_v27 = vand.u32 2147483648, %v595_v20  ;;  %vm600_vm11 = vcmp.eq.f32.partialorder %v595_v20, 0.0 }
 0x34b   :  { %v591_v36 = vpop.xlane.xlu1 %590 }
 0x355   :  { %v681_v21 = vpop.eup %680 }
 0x356   :  { %v683_v22 = vpop.eup %682  ;;  %v609_v23 = vmul.f32 %v681_v21, %v607_v19 }
 0x357   :  { %v597_v25 = vmul.f32 %v683_v22, %v595_v20 }
 0x358   :  { %v611_v26 = vsel %vm610_vm8, %v607_v19, %v609_v23 }
 0x359   :  { %v614_v28 = vsel %vm612_vm9, %v613_v24, %v611_v26  ;;  %v599_v29 = vsel %vm598_vm10, %v595_v20, %v597_v25 }
 0x35a   :  { %v615_v30 = vmax.f32 %v614_v28, 1e-08  ;;  %v602_v31 = vsel %vm600_vm11, %v601_v27, %v599_v29 }
 0x35b   :  { %v603_v33 = vmax.f32 %v602_v31, 1e-08 }
 0x35c   :  { %v617_v32 = vrot.slane %v615_v30, 2 }
 0x35e   :  { %v619_v34 = vmul.f32 %v617_v32, %v603_v33 }
 0x360   :  { %684 = vrcp.f32 %v619_v34 }
 0x36d   :  { %v685_v35 = vpop.eup %684 }
 0x36e   :  { %v621_v37 = vmul.f32 %v685_v35, %v591_v36 }
 0x370   :  { %v622_v38 = vsub.f32 1.0, %v621_v37 }
 0x372   :  { %v624_v39 = vsel %vm623_vm12, %v622_v38, 0.0 }
 0x373   :  { %625 = vadd.xlane.f32.xlu0 %v624_v39 }
 0x3fc   :  { %v626_v40 = vpop.xlane.xlu0 %625 }
 0x3fd   :  { %v627_v41 = vrot.slane %v626_v40, 4 }
 0x3ff   :  { %v628_v42 = vadd.f32 %v627_v41, %v626_v40 }
 0x401   :  { %v629_v43 = vrot.slane %v628_v42, 2 }
 0x403   :  { %v630_v44 = vadd.f32 %v629_v43, %v628_v42 }
 0x405   :  { %v631_v45 = vrot.slane %v630_v44, 1 }
 0x407   :  { %v632_v46 = vadd.f32 %v631_v45, %v630_v44 }
 0x409   :  { %671 = vpush %v632_v46 }
 0x43a   :  { %s672_s4 = spop %671 }
 0x43b   :  { %s636_s20 = smul.f32 0.5, %s672_s4 }
 0x43d   :  { %638 = sst [smem:[#allocation5]] %s636_s20 }
 0x43e   :  { %646 = dma.smem_to_hbm %s723_s21, 16, %s875_s5, [#allocation4]  }
 0x43f   :  { %716 = dma.done.wait [#allocation4], 16  }
 0x440   :  { %717 = vsyncadd [#allocation4], 4294967280 }
 0x441   :  { %650 = sfence }
 0x442   :  { %651 = vsyncpa [#allocation3], 1 }
 0x443   :  { %652 = vsyncpa [#allocation4], 1 }

</bundles_post_ra>
